<compile_context>
chip_gen: v7x
topology: tpu7x:2x2x1
jax: 0.10.0
libtpu: 0.0.40
codegen_flags: <defaults>
</compile_context>

<pallas_src>
import jax
import jax.numpy as jnp
from jax.experimental import pallas as pl
from jax.experimental.pallas import tpu as pltpu


def mlp_kernel(x_ref,
               w1_ref, b1_ref,
               w2_ref, b2_ref,
               w3_ref, b3_ref,
               w4_ref, b4_ref,
               o_ref):
    # ---- Layer 1: (tm, K) -> (tm, 128) on the VPU (K is tiny, skip the MXU).
    x = x_ref[...]                      # (tm, K) f32
    w1 = w1_ref[...]                    # (K, 128) f32
    k_dim = x.shape[1]
    h = b1_ref[...] + x[:, 0:1] * w1[0:1, :]
    for k in range(1, k_dim):
        h = h + x[:, k:k + 1] * w1[k:k + 1, :]
    h = jnp.maximum(h, 0.0)             # (tm, 128) f32

    # ---- Layer 2: bf16 MXU matmul, f32 accumulate, f32 bias/ReLU.
    h = jnp.dot(h.astype(jnp.bfloat16), w2_ref[...],
                preferred_element_type=jnp.float32)
    h = jnp.maximum(h + b2_ref[...], 0.0)

    # ---- Layer 3.
    h = jnp.dot(h.astype(jnp.bfloat16), w3_ref[...],
                preferred_element_type=jnp.float32)
    h = jnp.maximum(h + b3_ref[...], 0.0)

    # ---- Output layer: N padded to 128 in the wrapper -> lane-dense store.
    o_ref[...] = jnp.dot(h.astype(jnp.bfloat16), w4_ref[...],
                         preferred_element_type=jnp.float32) + b4_ref[...]


def net_forward(obs, params, state=None, *, tm_max=256):
    """Pallas equivalent of Net.forward. Returns (logits, state)."""
    obs = jnp.asarray(obs, dtype=jnp.float32)
    batch = obs.shape[0]
    x = obs.reshape(batch, -1)          # obs.view(batch, -1)
    in_dim = x.shape[1]

    (w1, b1), (w2, b2), (w3, b3), (w4, b4) = params
    hidden = w1.shape[1]
    n_act = w4.shape[1]

    # Lane-dense output layer: zero-pad N (=2) up to a multiple of 128.
    n_pad = max(128, ((n_act + 127) // 128) * 128)
    w4p = jnp.zeros((hidden, n_pad), jnp.float32).at[:, :n_act].set(w4)
    b4p = jnp.zeros((1, n_pad), jnp.float32).at[:, :n_act].set(b4)

    # bf16 weights for the MXU matmuls (accumulation stays f32 in-kernel).
    w2b = w2.astype(jnp.bfloat16)
    w3b = w3.astype(jnp.bfloat16)
    w4b = w4p.astype(jnp.bfloat16)

    # Batch tiling: sublane-aligned tile, padded batch so every block is full.
    if batch <= tm_max:
        tm = ((batch + 7) // 8) * 8
    else:
        tm = tm_max
    num_tiles = pl.cdiv(batch, tm)
    b_pad = num_tiles * tm
    if b_pad != batch:
        x = jnp.pad(x, ((0, b_pad - batch), (0, 0)))

    logits_pad = pl.pallas_call(
        mlp_kernel,
        out_shape=jax.ShapeDtypeStruct((b_pad, n_pad), jnp.float32),
        grid=(num_tiles,),
        in_specs=[
            pl.BlockSpec((tm, in_dim), lambda i: (i, 0)),       # x (batch-tiled)
            pl.BlockSpec((in_dim, hidden), lambda i: (0, 0)),   # w1 (resident)
            pl.BlockSpec((1, hidden), lambda i: (0, 0)),        # b1
            pl.BlockSpec((hidden, hidden), lambda i: (0, 0)),   # w2 (bf16)
            pl.BlockSpec((1, hidden), lambda i: (0, 0)),        # b2
            pl.BlockSpec((hidden, hidden), lambda i: (0, 0)),   # w3 (bf16)
            pl.BlockSpec((1, hidden), lambda i: (0, 0)),        # b3
            pl.BlockSpec((hidden, n_pad), lambda i: (0, 0)),    # w4 (bf16, padded)
            pl.BlockSpec((1, n_pad), lambda i: (0, 0)),         # b4 (padded)
        ],
        out_specs=pl.BlockSpec((tm, n_pad), lambda i: (i, 0)),
        compiler_params=pltpu.CompilerParams(
            dimension_semantics=("parallel",)),
    )(x, w1, b1, w2b, b2, w3b, b3, w4b, b4p)

    logits = logits_pad[:batch, :n_act]
    return logits, state


def init_params(key, in_dim, hidden, out_dim):
    """Deterministic synthetic parameters (same shapes as the PyTorch module)."""
    dims = [(in_dim, hidden), (hidden, hidden), (hidden, hidden), (hidden, out_dim)]
    params = []
    for i, (fan_in, fan_out) in enumerate(dims):
        kw, kb, key = jax.random.split(jax.random.fold_in(key, i), 3)
        bound = 1.0 / jnp.sqrt(jnp.float32(fan_in))
        w = jax.random.uniform(kw, (fan_in, fan_out), jnp.float32, -bound, bound)
        b = jax.random.uniform(kb, (1, fan_out), jnp.float32, -bound, bound)
        params.append((w, b))
    return params


def reference_forward(obs, params):
    x = obs.reshape(obs.shape[0], -1)
    (w1, b1), (w2, b2), (w3, b3), (w4, b4) = params
    h = jnp.maximum(x @ w1 + b1, 0.0)
    h = jnp.maximum(h @ w2 + b2, 0.0)
    h = jnp.maximum(h @ w3 + b3, 0.0)
    return h @ w4 + b4


if __name__ == "__main__":
    key = jax.random.PRNGKey(0)

    # CartPole-v0: observation dim 4, action dim 2
    state_dim, hidden, action_dim = 4, 128, 2
    batch = 8

    k_obs, k_par = jax.random.split(key)
    obs = jax.random.normal(k_obs, (batch, state_dim), dtype=jnp.float32)
    params = init_params(k_par, state_dim, hidden, action_dim)

    logits, state = net_forward(obs, params, state=None)
    logits = jax.block_until_ready(logits)

    ref = reference_forward(obs, params)
    assert logits.shape == (batch, action_dim)
    # Tolerance accounts for bf16 weight/activation rounding in the MXU matmuls
    # (accumulation is f32); f32 reference.
    assert jnp.allclose(logits, ref, atol=3e-2, rtol=3e-2)

    print("KERNEL_OK")
</pallas_src>

<mosaic_0001>
module attributes {stable_mosaic.version = 11 : i64} {
  func.func @mlp_kernel(%arg0: i32, %arg1: memref<8x4xf32, #tpu.memory_space<vmem>>, %arg2: memref<4x128xf32, #tpu.memory_space<vmem>>, %arg3: memref<1x128xf32, #tpu.memory_space<vmem>>, %arg4: memref<128x128xbf16, #tpu.memory_space<vmem>>, %arg5: memref<1x128xf32, #tpu.memory_space<vmem>>, %arg6: memref<128x128xbf16, #tpu.memory_space<vmem>>, %arg7: memref<1x128xf32, #tpu.memory_space<vmem>>, %arg8: memref<128x128xbf16, #tpu.memory_space<vmem>>, %arg9: memref<1x128xf32, #tpu.memory_space<vmem>>, %arg10: memref<8x128xf32, #tpu.memory_space<vmem>>) attributes {dimension_semantics = [#tpu.dimension_semantics<parallel>], iteration_bounds = array<i64: 1>, scalar_prefetch = 0 : i64, scratch_operands = 0 : i64, tpu.core_type = #tpu.core_type<tc>, window_params = [{transform_indices = @transform_0, window_bounds = array<i64: 8, 4>}, {pipeline_mode = #tpu.pipeline_mode<synchronous>, transform_indices = @transform_1, window_bounds = array<i64: 4, 128>}, {pipeline_mode = #tpu.pipeline_mode<synchronous>, transform_indices = @transform_2, window_bounds = array<i64: 1, 128>}, {pipeline_mode = #tpu.pipeline_mode<synchronous>, transform_indices = @transform_3, window_bounds = array<i64: 128, 128>}, {pipeline_mode = #tpu.pipeline_mode<synchronous>, transform_indices = @transform_4, window_bounds = array<i64: 1, 128>}, {pipeline_mode = #tpu.pipeline_mode<synchronous>, transform_indices = @transform_5, window_bounds = array<i64: 128, 128>}, {pipeline_mode = #tpu.pipeline_mode<synchronous>, transform_indices = @transform_6, window_bounds = array<i64: 1, 128>}, {pipeline_mode = #tpu.pipeline_mode<synchronous>, transform_indices = @transform_7, window_bounds = array<i64: 128, 128>}, {pipeline_mode = #tpu.pipeline_mode<synchronous>, transform_indices = @transform_8, window_bounds = array<i64: 1, 128>}, {transform_indices = @transform_9, window_bounds = array<i64: 8, 128>}]} {
    %c0 = arith.constant 0 : index
    %c0_0 = arith.constant 0 : index
    %0 = vector.load %arg1[%c0, %c0_0] : memref<8x4xf32, #tpu.memory_space<vmem>>, vector<8x4xf32>
    %c0_1 = arith.constant 0 : index
    %c0_2 = arith.constant 0 : index
    %1 = vector.load %arg2[%c0_1, %c0_2] : memref<4x128xf32, #tpu.memory_space<vmem>>, vector<4x128xf32>
    %c0_3 = arith.constant 0 : index
    %c0_4 = arith.constant 0 : index
    %2 = vector.load %arg3[%c0_3, %c0_4] : memref<1x128xf32, #tpu.memory_space<vmem>>, vector<1x128xf32>
    %3 = vector.extract_strided_slice %0 {offsets = [0, 0], sizes = [8, 1], strides = [1, 1]} : vector<8x4xf32> to vector<8x1xf32>
    %4 = vector.extract_strided_slice %1 {offsets = [0, 0], sizes = [1, 128], strides = [1, 1]} : vector<4x128xf32> to vector<1x128xf32>
    %5 = vector.broadcast %3 : vector<8x1xf32> to vector<8x128xf32>
    %6 = vector.broadcast %4 : vector<1x128xf32> to vector<8x128xf32>
    %7 = arith.mulf %5, %6 : vector<8x128xf32>
    %8 = vector.broadcast %2 : vector<1x128xf32> to vector<8x128xf32>
    %9 = arith.addf %8, %7 : vector<8x128xf32>
    %10 = vector.extract_strided_slice %0 {offsets = [0, 1], sizes = [8, 1], strides = [1, 1]} : vector<8x4xf32> to vector<8x1xf32>
    %11 = vector.extract_strided_slice %1 {offsets = [1, 0], sizes = [1, 128], strides = [1, 1]} : vector<4x128xf32> to vector<1x128xf32>
    %12 = vector.broadcast %10 : vector<8x1xf32> to vector<8x128xf32>
    %13 = vector.broadcast %11 : vector<1x128xf32> to vector<8x128xf32>
    %14 = arith.mulf %12, %13 : vector<8x128xf32>
    %15 = arith.addf %9, %14 : vector<8x128xf32>
    %16 = vector.extract_strided_slice %0 {offsets = [0, 2], sizes = [8, 1], strides = [1, 1]} : vector<8x4xf32> to vector<8x1xf32>
    %17 = vector.extract_strided_slice %1 {offsets = [2, 0], sizes = [1, 128], strides = [1, 1]} : vector<4x128xf32> to vector<1x128xf32>
    %18 = vector.broadcast %16 : vector<8x1xf32> to vector<8x128xf32>
    %19 = vector.broadcast %17 : vector<1x128xf32> to vector<8x128xf32>
    %20 = arith.mulf %18, %19 : vector<8x128xf32>
    %21 = arith.addf %15, %20 : vector<8x128xf32>
    %22 = vector.extract_strided_slice %0 {offsets = [0, 3], sizes = [8, 1], strides = [1, 1]} : vector<8x4xf32> to vector<8x1xf32>
    %23 = vector.extract_strided_slice %1 {offsets = [3, 0], sizes = [1, 128], strides = [1, 1]} : vector<4x128xf32> to vector<1x128xf32>
    %24 = vector.broadcast %22 : vector<8x1xf32> to vector<8x128xf32>
    %25 = vector.broadcast %23 : vector<1x128xf32> to vector<8x128xf32>
    %26 = arith.mulf %24, %25 : vector<8x128xf32>
    %27 = arith.addf %21, %26 : vector<8x128xf32>
    %cst = arith.constant 0.000000e+00 : f32
    %28 = vector.broadcast %cst : f32 to vector<8x128xf32>
    %29 = arith.maximumf %27, %28 : vector<8x128xf32>
    %30 = arith.truncf %29 : vector<8x128xf32> to vector<8x128xbf16>
    %c0_5 = arith.constant 0 : index
    %c0_6 = arith.constant 0 : index
    %31 = vector.load %arg4[%c0_5, %c0_6] : memref<128x128xbf16, #tpu.memory_space<vmem>>, vector<128x128xbf16>
    %cst_7 = arith.constant dense<0.000000e+00> : vector<8x128xf32>
    %32 = tpu.matmul %30, %31, %cst_7 {dimension_numbers = #tpu.dot_dimension_numbers<[1], [0], [0], [1], [0, 0, 1, 1], [], []>} : vector<8x128xbf16>, vector<128x128xbf16>, vector<8x128xf32> -> vector<8x128xf32>
    %c0_8 = arith.constant 0 : index
    %c0_9 = arith.constant 0 : index
    %33 = vector.load %arg5[%c0_8, %c0_9] : memref<1x128xf32, #tpu.memory_space<vmem>>, vector<1x128xf32>
    %34 = vector.broadcast %33 : vector<1x128xf32> to vector<8x128xf32>
    %35 = arith.addf %32, %34 : vector<8x128xf32>
    %cst_10 = arith.constant 0.000000e+00 : f32
    %36 = vector.broadcast %cst_10 : f32 to vector<8x128xf32>
    %37 = arith.maximumf %35, %36 : vector<8x128xf32>
    %38 = arith.truncf %37 : vector<8x128xf32> to vector<8x128xbf16>
    %c0_11 = arith.constant 0 : index
    %c0_12 = arith.constant 0 : index
    %39 = vector.load %arg6[%c0_11, %c0_12] : memref<128x128xbf16, #tpu.memory_space<vmem>>, vector<128x128xbf16>
    %cst_13 = arith.constant dense<0.000000e+00> : vector<8x128xf32>
    %40 = tpu.matmul %38, %39, %cst_13 {dimension_numbers = #tpu.dot_dimension_numbers<[1], [0], [0], [1], [0, 0, 1, 1], [], []>} : vector<8x128xbf16>, vector<128x128xbf16>, vector<8x128xf32> -> vector<8x128xf32>
    %c0_14 = arith.constant 0 : index
    %c0_15 = arith.constant 0 : index
    %41 = vector.load %arg7[%c0_14, %c0_15] : memref<1x128xf32, #tpu.memory_space<vmem>>, vector<1x128xf32>
    %42 = vector.broadcast %41 : vector<1x128xf32> to vector<8x128xf32>
    %43 = arith.addf %40, %42 : vector<8x128xf32>
    %cst_16 = arith.constant 0.000000e+00 : f32
    %44 = vector.broadcast %cst_16 : f32 to vector<8x128xf32>
    %45 = arith.maximumf %43, %44 : vector<8x128xf32>
    %46 = arith.truncf %45 : vector<8x128xf32> to vector<8x128xbf16>
    %c0_17 = arith.constant 0 : index
    %c0_18 = arith.constant 0 : index
    %47 = vector.load %arg8[%c0_17, %c0_18] : memref<128x128xbf16, #tpu.memory_space<vmem>>, vector<128x128xbf16>
    %cst_19 = arith.constant dense<0.000000e+00> : vector<8x128xf32>
    %48 = tpu.matmul %46, %47, %cst_19 {dimension_numbers = #tpu.dot_dimension_numbers<[1], [0], [0], [1], [0, 0, 1, 1], [], []>} : vector<8x128xbf16>, vector<128x128xbf16>, vector<8x128xf32> -> vector<8x128xf32>
    %c0_20 = arith.constant 0 : index
    %c0_21 = arith.constant 0 : index
    %49 = vector.load %arg9[%c0_20, %c0_21] : memref<1x128xf32, #tpu.memory_space<vmem>>, vector<1x128xf32>
    %50 = vector.broadcast %49 : vector<1x128xf32> to vector<8x128xf32>
    %51 = arith.addf %48, %50 : vector<8x128xf32>
    %c0_22 = arith.constant 0 : index
    %c0_23 = arith.constant 0 : index
    %52 = vector.load %arg10[%c0_22, %c0_23] : memref<8x128xf32, #tpu.memory_space<vmem>>, vector<8x128xf32>
    tpu.vector_store %arg10[%c0_22, %c0_23], %51 {strides = array<i32>} : memref<8x128xf32, #tpu.memory_space<vmem>>, vector<8x128xf32>,
    return
  }
  func.func @transform_0(%arg0: i32) -> (i32, i32) {
    %c0_i32 = arith.constant 0 : i32
    %c0_i32_0 = arith.constant 0 : i32
    return %arg0, %c0_i32 : i32, i32
  }
  func.func @transform_1(%arg0: i32) -> (i32, i32) {
    %c0_i32 = arith.constant 0 : i32
    %c0_i32_0 = arith.constant 0 : i32
    %c0_i32_1 = arith.constant 0 : i32
    return %c0_i32, %c0_i32_0 : i32, i32
  }
  func.func @transform_2(%arg0: i32) -> (i32, i32) {
    %c0_i32 = arith.constant 0 : i32
    %c0_i32_0 = arith.constant 0 : i32
    %c0_i32_1 = arith.constant 0 : i32
    return %c0_i32, %c0_i32_0 : i32, i32
  }
  func.func @transform_3(%arg0: i32) -> (i32, i32) {
    %c0_i32 = arith.constant 0 : i32
    %c0_i32_0 = arith.constant 0 : i32
    %c0_i32_1 = arith.constant 0 : i32
    return %c0_i32, %c0_i32_0 : i32, i32
  }
  func.func @transform_4(%arg0: i32) -> (i32, i32) {
    %c0_i32 = arith.constant 0 : i32
    %c0_i32_0 = arith.constant 0 : i32
    %c0_i32_1 = arith.constant 0 : i32
    return %c0_i32, %c0_i32_0 : i32, i32
  }
  func.func @transform_5(%arg0: i32) -> (i32, i32) {
    %c0_i32 = arith.constant 0 : i32
    %c0_i32_0 = arith.constant 0 : i32
    %c0_i32_1 = arith.constant 0 : i32
    return %c0_i32, %c0_i32_0 : i32, i32
  }
  func.func @transform_6(%arg0: i32) -> (i32, i32) {
    %c0_i32 = arith.constant 0 : i32
    %c0_i32_0 = arith.constant 0 : i32
    %c0_i32_1 = arith.constant 0 : i32
    return %c0_i32, %c0_i32_0 : i32, i32
  }
  func.func @transform_7(%arg0: i32) -> (i32, i32) {
    %c0_i32 = arith.constant 0 : i32
    %c0_i32_0 = arith.constant 0 : i32
    %c0_i32_1 = arith.constant 0 : i32
    return %c0_i32, %c0_i32_0 : i32, i32
  }
  func.func @transform_8(%arg0: i32) -> (i32, i32) {
    %c0_i32 = arith.constant 0 : i32
    %c0_i32_0 = arith.constant 0 : i32
    %c0_i32_1 = arith.constant 0 : i32
    return %c0_i32, %c0_i32_0 : i32, i32
  }
  func.func @transform_9(%arg0: i32) -> (i32, i32) {
    %c0_i32 = arith.constant 0 : i32
    %c0_i32_0 = arith.constant 0 : i32
    return %arg0, %c0_i32 : i32, i32
  }
}

</mosaic_0001>

<bundles_post_ra>
// kernel: tpu_custom_call.1
= control target key start
LH: loop header
LB: loop body
LE: loop exit
PB: predicated region body
PF: predicated region fallthrough
CT: control target
= control target key end

     0   :  { %14 = vsyncpa [#allocation3], 0  ;;  %s905_s0 = inlined_call_operand.vmem [shape: f32[8,4], index: 0, kind: input, shape index: {}]   ;;  %s906_s1 = inlined_call_operand.vmem [shape: f32[4,128], index: 1, kind: input, shape index: {}]   ;;  %s907_s2 = inlined_call_operand.vmem [shape: f32[1,128], index: 2, kind: input, shape index: {}]   ;;  %s908_s3 = inlined_call_operand.hbm [shape: bf16[128,128], index: 3, kind: input, shape index: {}]   ;;  %s909_s4 = inlined_call_operand.vmem [shape: f32[1,128], index: 4, kind: input, shape index: {}]   ;;  %s910_s5 = inlined_call_operand.hbm [shape: bf16[128,128], index: 5, kind: input, shape index: {}]   ;;  %s911_s6 = inlined_call_operand.vmem [shape: f32[1,128], index: 6, kind: input, shape index: {}]   ;;  %s912_s7 = inlined_call_operand.hbm [shape: bf16[128,128], index: 7, kind: input, shape index: {}]   ;;  %s913_s8 = inlined_call_operand.vmem [shape: f32[1,128], index: 8, kind: input, shape index: {}]   ;;  %s914_s9 = inlined_call_operand.hbm [shape: f32[8,128], index: 9, kind: output, shape index: {}]  }
   0x1   :  { %15 = vsyncpa [#allocation6], 0 }
   0x2   :  { %16 = vsyncpa [#allocation4], 0  ;;  %s731_s30 = smov [#allocation5]   ;;  %s732_s11 = smov [#allocation2]  }
   0x3   :  { %s42_s10 = sshll.u32 %s731_s30, 4  ;;  %s28_s12 = sshll.u32 %s732_s11, 4  ;;  %s43_s10 = int_to_ptr.vmem [resolvable:$true] %s42_s10  ;;  %s793_s12 = int_to_ptr.vmem [resolvable:$true] %s28_s12 }
   0x4   :  { %s637_s15 = scalar_lea.hbm %s910_s5, 1024 }
   0x5   :  { %p638_p0 = scmp.ne.s32.totalorder %s910_s5, %s637_s15  ;;  %p641_p1 = scmp.lt.u32.totalorder %s637_s15, %s910_s5 }
   0x7   :  { %p643_p2 = pnand %p641_p1, %p638_p0 }
   0x9   :  { %646 = shalt.err (!%p643_p2)
}
   0xa   :  { %s647_s20 = scalar_lea.vmem %s43_s10, 1024  ;;  %p652_p4 = scmp.lt.s32.totalorder %s43_s10, %s43_s10 }
   0xb   :  { %p648_p3 = scmp.ne.s32.totalorder %s43_s10, %s647_s20  ;;  %p653_p5 = scmp.lt.s32.totalorder %s647_s20, %s647_s20 }
   0xd   :  { %p654_p6 = por %p653_p5, %p652_p4 }
   0xf   :  { %p655_p7 = pnand %p654_p6, %p648_p3 }
  0x11   :  { %658 = shalt.err (!%p655_p7)
}
  0x12   :  { %s733_s21 = smov 64   ;;  %s734_s22 = smov 4  }
  0x13   :  { %48 = dma.hbm_to_vmem [thread:$0]  %s910_s5, 1024, %s43_s10, [#allocation6], %s733_s21, %s733_s21, %s734_s22  }
  0x14   :  { %s659_s27 = scalar_lea.hbm %s908_s3, 1024 }
  0x15   :  { %p660_p8 = scmp.ne.s32.totalorder %s908_s3, %s659_s27  ;;  %p663_p9 = scmp.lt.u32.totalorder %s659_s27, %s908_s3 }
  0x17   :  { %p665_p10 = pnand %p663_p9, %p660_p8 }
  0x19   :  { %668 = shalt.err (!%p665_p10)
}
  0x1a   :  { %s669_s13 = scalar_lea.vmem %s793_s12, 1024  ;;  %p674_p12 = scmp.lt.s32.totalorder %s793_s12, %s793_s12 }
  0x1b   :  { %p670_p11 = scmp.ne.s32.totalorder %s793_s12, %s669_s13  ;;  %p675_p13 = scmp.lt.s32.totalorder %s669_s13, %s669_s13 }
  0x1d   :  { %p676_p0 = por %p675_p13, %p674_p12 }
  0x1f   :  { %p677_p1 = pnand %p676_p0, %p670_p11 }
  0x21   :  { %680 = shalt.err (!%p677_p1)
}
  0x22   :  { %34 = dma.hbm_to_vmem [thread:$0]  %s908_s3, 1024, %s793_s12, [#allocation3], %s733_s21, %s733_s21, %s734_s22  }
  0x23   :  { %s735_s14 = smov [#allocation7]   ;;  %s681_s18 = scalar_lea.hbm %s912_s7, 1024 }
  0x24   :  { %s56_s15 = sshll.u32 %s735_s14, 4  ;;  %p682_p2 = scmp.ne.s32.totalorder %s912_s7, %s681_s18  ;;  %s57_s15 = int_to_ptr.vmem [resolvable:$true] %s56_s15 }
  0x25   :  { %p685_p3 = scmp.lt.u32.totalorder %s681_s18, %s912_s7 }
  0x27   :  { %p687_p4 = pnand %p685_p3, %p682_p2 }
  0x29   :  { %690 = shalt.err (!%p687_p4)
}
  0x2a   :  { %s691_s25 = scalar_lea.vmem %s57_s15, 1024  ;;  %p696_p6 = scmp.lt.s32.totalorder %s57_s15, %s57_s15 }
  0x2b   :  { %p692_p5 = scmp.ne.s32.totalorder %s57_s15, %s691_s25  ;;  %p697_p7 = scmp.lt.s32.totalorder %s691_s25, %s691_s25 }
  0x2d   :  { %p698_p8 = por %p697_p7, %p696_p6 }
  0x2f   :  { %p699_p9 = pnand %p698_p8, %p692_p5 }
  0x31   :  { %702 = shalt.err (!%p699_p9)
}
  0x32   :  { %62 = dma.hbm_to_vmem [thread:$0]  %s912_s7, 1024, %s57_s15, [#allocation6], %s733_s21, %s733_s21, %s734_s22  }
  0x33   :  { %725 = dma.done.wait [#allocation3], 1024  }
  0x34   :  { %726 = vsyncadd [#allocation3], 4294966272 }
  0x35   :  { %727 = dma.done.wait [#allocation6], 2048  }
  0x36   :  { %728 = vsyncadd [#allocation6], 4294965248  ;;  %v736_v0 = vmov 0   ;;  %v737_v1 = vmov 2   ;;  %v738_v2 = vmov 0.0   ;;  %v75_v3 = vld [vmem:[%s905_s0] sm:$0xff]  ;;  %v83_v20 = vlaneseq }
  0x37   :  { %608 = vset.pattern.permute.xlu0 %v736_v0  ;;  %610 = vset.pattern.permute.xlu1 %v737_v1  ;;  %v613_v4 = vld [vmem:[#allocation2] sm:$0xff]   ;;  %v614_v5 = vld [vmem:[#allocation2 + $0x8] sm:$0xff]   ;;  %v739_v6 = vmov 1   ;;  %v740_v7 = vmov 3   ;;  %v615_v8 = vld [vmem:[#allocation2 + $0x10] sm:$0xff]   ;;  %vm741_vm0 = vmmov 0  }
  0x38   :  { %536 = vmatprep.subr.bf16.mxu0 %v738_v2  ;;  %556 = vmatprep.subr.bf16.mxu1 %v738_v2  ;;  %v616_v9 = vld [vmem:[#allocation2 + $0x18] sm:$0xff]   ;;  %v617_v10 = vld [vmem:[#allocation2 + $0x20] sm:$0xff]   ;;  %v618_v12 = vld [vmem:[#allocation2 + $0x28] sm:$0xff]   ;;  %v84_v21 = vshrl.u32 %v83_v20, 7  ;;  %s742_s11 = smov [#allocation8]  }
  0x39   :  { %80 = vperm.xlu0 %608, %v75_v3   ;;  %106 = vperm.xlu1 %610, %v75_v3   ;;  %v621_v11 = vld [vmem:[#allocation5] sm:$0xff]   ;;  %v622_v13 = vld [vmem:[#allocation5 + $0x8] sm:$0xff]   ;;  %v619_v14 = vld [vmem:[#allocation2 + $0x30] sm:$0xff]   ;;  %s471_s13 = sshll.u32 %s742_s11, 4  ;;  %s472_s13 = int_to_ptr.vmem [resolvable:$true] %s471_s13 }
  0x3a   :  { %537 = vmatpush3.bf16.msra.mxu0 %v613_v4  ;;  %552 = vmatprep.mubr.msk.bf16.mxu0 %vm741_vm0, %v738_v2  ;;  %v623_v15 = vld [vmem:[#allocation5 + $0x10] sm:$0xff]   ;;  %v620_v16 = vld [vmem:[#allocation2 + $0x38] sm:$0xff]   ;;  %v625_v18 = vld [vmem:[#allocation5 + $0x20] sm:$0xff]   ;;  %v85_v22 = vsub.s32 0, %v84_v21  ;;  %v101_v25 = vsub.s32 1, %v84_v21  ;;  %v111_v27 = vsub.s32 2, %v84_v21  ;;  %p708_p11 = scmp.lt.s32.totalorder %s472_s13, %s472_s13 }
  0x3b   :  { %538 = vmatprep.subr.bf16.mxu0 %v738_v2  ;;  %572 = vmatprep.mubr.msk.bf16.mxu1 %vm741_vm0, %v738_v2  ;;  %v624_v17 = vld [vmem:[#allocation5 + $0x18] sm:$0xff]   ;;  %v626_v19 = vld [vmem:[#allocation5 + $0x28] sm:$0xff]   ;;  %v76_v23 = vld [vmem:[%s906_s1] sm:$0xf]  ;;  %v121_v29 = vsub.s32 3, %v84_v21 }
  0x3c   :  { %557 = vmatpush3.bf16.msra.mxu1 %v621_v11  ;;  %v86_v24 = vrot.slane %v76_v23, %v85_v22  ;;  %v102_v31 = vrot.slane %v76_v23, %v101_v25  ;;  %v481_v32 = vld [vmem:[%s907_s2] ss:$0 sm:$0xff]  ;;  %v112_v33 = vrot.slane %v76_v23, %v111_v27  ;;  %v628_v47 = vld [vmem:[#allocation5 + $0x38] sm:$0xff]   ;;  %v629_v48 = vld [vmem:[#allocation7] sm:$0xff]  }
  0x3d   :  { %609 = vset.pattern.permute.xlu0 %v739_v6  ;;  %611 = vset.pattern.permute.xlu1 %v740_v7  ;;  %v122_v34 = vrot.slane %v76_v23, %v121_v29  ;;  %v627_v46 = vld [vmem:[#allocation5 + $0x30] sm:$0xff]   ;;  %v630_v49 = vld [vmem:[#allocation7 + $0x8] sm:$0xff]   ;;  %v632_v51 = vld [vmem:[#allocation7 + $0x18] sm:$0xff]  }
  0x3e   :  { %96 = vperm.xlu0 %609, %v75_v3   ;;  %116 = vperm.xlu1 %611, %v75_v3   ;;  %v631_v50 = vld [vmem:[#allocation7 + $0x10] sm:$0xff]   ;;  %v633_v52 = vld [vmem:[#allocation7 + $0x20] sm:$0xff]   ;;  %v634_v53 = vld [vmem:[#allocation7 + $0x28] sm:$0xff]  }
  0x3f   :  { %539 = vmatpush3.bf16.msra.mxu0 %v614_v5  ;;  %558 = vmatprep.subr.bf16.mxu1 %v738_v2  ;;  %v482_v54 = vld [vmem:[%s909_s4] ss:$0 sm:$0xff]  ;;  %v636_v63 = vld [vmem:[#allocation7 + $0x38] sm:$0xff]  }
  0x40   :  { %540 = vmatprep.subr.bf16.mxu0 %v738_v2  ;;  %559 = vmatpush3.bf16.msra.mxu1 %v622_v13  ;;  %v635_v62 = vld [vmem:[#allocation7 + $0x30] sm:$0xff]  }
  0x41   :  { %560 = vmatprep.subr.bf16.mxu1 %v738_v2  ;;  %v491_v0 = vld [vmem:[%s911_s6] ss:$0 sm:$0xff]  ;;  %s703_s6 = scalar_lea.vmem %s472_s13, 128 }
  0x42   :  { %612 = vset.pattern.permute.xlu0 %v740_v7  ;;  %p704_p10 = scmp.ne.s32.totalorder %s472_s13, %s703_s6  ;;  %p709_p12 = scmp.lt.s32.totalorder %s703_s6, %s703_s6 }
  0x43   :  { %541 = vmatpush3.bf16.msra.mxu0 %v615_v8 }
  0x44   :  { %542 = vmatprep.subr.bf16.mxu0 %v738_v2  ;;  %561 = vmatpush3.bf16.msra.mxu1 %v623_v15  ;;  %p710_p13 = por %p709_p12, %p708_p11 }
  0x45   :  { %562 = vmatprep.subr.bf16.mxu1 %v738_v2 }
  0x46   :  { %p711_p0 = pnand %p710_p13, %p704_p10 }
  0x47   :  { %543 = vmatpush3.bf16.msra.mxu0 %v616_v9  ;;  %v500_v9 = vld [vmem:[%s913_s8] ss:$0 sm:$0xff] }
  0x48   :  { %544 = vmatprep.subr.bf16.mxu0 %v738_v2  ;;  %563 = vmatpush3.bf16.msra.mxu1 %v624_v17 }
  0x49   :  { %564 = vmatprep.subr.bf16.mxu1 %v738_v2 }
  0x4b   :  { %545 = vmatpush3.bf16.msra.mxu0 %v617_v10 }
  0x4c   :  { %546 = vmatprep.subr.bf16.mxu0 %v738_v2  ;;  %565 = vmatpush3.bf16.msra.mxu1 %v625_v18 }
  0x4d   :  { %566 = vmatprep.subr.bf16.mxu1 %v738_v2 }
  0x4f   :  { %547 = vmatpush3.bf16.msra.mxu0 %v618_v12 }
  0x50   :  { %548 = vmatprep.subr.bf16.mxu0 %v738_v2  ;;  %567 = vmatpush3.bf16.msra.mxu1 %v626_v19 }
  0x51   :  { %568 = vmatprep.subr.bf16.mxu1 %v738_v2 }
  0x53   :  { %549 = vmatpush3.bf16.msra.mxu0 %v619_v14 }
  0x54   :  { %550 = vmatprep.subr.bf16.mxu0 %v738_v2  ;;  %569 = vmatpush3.bf16.msra.mxu1 %v627_v46 }
  0x55   :  { %570 = vmatprep.subr.bf16.mxu1 %v738_v2 }
  0x57   :  { %551 = vmatpush3.bf16.msra.mxu0 %v620_v16 }
  0x58   :  { %576 = vmatprep.subr.bf16.mxu0 %v738_v2  ;;  %571 = vmatpush3.bf16.msra.mxu1 %v628_v47 }
  0xb8   :  { %v81_v26 = vpop.permute.xlu0 %80  ;;  %v107_v28 = vpop.permute.xlu1 %106 }
  0xb9   :  { %v87_v30 = vmul.f32 %v86_v24, %v81_v26  ;;  %v113_v39 = vmul.f32 %v112_v33, %v107_v28 }
  0xbb   :  { %v94_v37 = vadd.f32 %v481_v32, %v87_v30 }
  0xbd   :  { %v97_v35 = vpop.permute.xlu0 %96  ;;  %v117_v36 = vpop.permute.xlu1 %116 }
  0xbe   :  { %v103_v38 = vmul.f32 %v102_v31, %v97_v35  ;;  %v123_v41 = vmul.f32 %v122_v34, %v117_v36 }
  0xc0   :  { %v104_v40 = vadd.f32 %v103_v38, %v94_v37 }
  0xc2   :  { %v114_v42 = vadd.f32 %v113_v39, %v104_v40 }
  0xc4   :  { %v124_v43 = vadd.f32 %v123_v41, %v114_v42 }
  0xc6   :  { %v125_v44 = vmax.f32 %v124_v43, 0.0 }
  0xc8   :  { %v126_v45 = vpack.c.bf16 %v125_v44, %v125_v44 }
  0xca   :  { %553 = vmatmul.mubr.bf16.vlgmr.msra.gmra.mrb[0].mxu0 %v126_v45 }
  0xcb   :  { %592 = vmatprep.mubr.msk.bf16.mxu0 %vm741_vm0, %v738_v2  ;;  %577 = vmatpush3.bf16.msra.mxu0 %v629_v48 }
  0xcc   :  { %578 = vmatprep.subr.bf16.mxu0 %v738_v2 }
  0xcf   :  { %579 = vmatpush3.bf16.msra.mxu0 %v630_v49 }
  0xd0   :  { %580 = vmatprep.subr.bf16.mxu0 %v738_v2 }
  0xd3   :  { %581 = vmatpush3.bf16.msra.mxu0 %v631_v50 }
  0xd4   :  { %582 = vmatprep.subr.bf16.mxu0 %v738_v2 }
  0xd7   :  { %583 = vmatpush3.bf16.msra.mxu0 %v632_v51 }
  0xd8   :  { %584 = vmatprep.subr.bf16.mxu0 %v738_v2 }
  0xdb   :  { %585 = vmatpush3.bf16.msra.mxu0 %v633_v52 }
  0xdc   :  { %586 = vmatprep.subr.bf16.mxu0 %v738_v2 }
  0xdf   :  { %587 = vmatpush3.bf16.msra.mxu0 %v634_v53 }
  0xe0   :  { %588 = vmatprep.subr.bf16.mxu0 %v738_v2 }
  0xe3   :  { %589 = vmatpush3.bf16.msra.mxu0 %v635_v62 }
  0xe4   :  { %590 = vmatprep.subr.bf16.mxu0 %v738_v2 }
  0xe7   :  { %591 = vmatpush3.bf16.msra.mxu0 %v636_v63 }
 0x19d   :  { %v232_v55 = vpop.f32.mrb[0].mxu0 }
 0x19e   :  { %v233_v56 = vadd.f32 %v482_v54, %v232_v55  ;;  %v554_v57 = vpop.f32.mrb[1].mxu0 }
 0x19f   :  { %v235_v58 = vpop.f32.mrb[2].mxu0 }
 0x1a0   :  { %v238_v59 = vmax.f32 %v233_v56, 0.0  ;;  %v555_v60 = vpop.f32.mrb[3].mxu0 }
 0x1a2   :  { %v239_v61 = vpack.c.bf16 %v238_v59, %v238_v59 }
 0x1a4   :  { %573 = vmatmul.mubr.bf16.vlgmr.msra.gmra.mrb[0].mxu1 %v239_v61 }
 0x277   :  { %v345_v1 = vpop.f32.mrb[0].mxu1 }
 0x278   :  { %v346_v3 = vadd.f32 %v491_v0, %v345_v1  ;;  %v574_v4 = vpop.f32.mrb[1].mxu1 }
 0x279   :  { %v348_v5 = vpop.f32.mrb[2].mxu1 }
 0x27a   :  { %v351_v6 = vmax.f32 %v346_v3, 0.0  ;;  %v575_v7 = vpop.f32.mrb[3].mxu1 }
 0x27c   :  { %v352_v8 = vpack.c.bf16 %v351_v6, %v351_v6 }
 0x27e   :  { %593 = vmatmul.mubr.bf16.vlgmr.msra.gmra.mrb[4].mxu0 %v352_v8 }
 0x351   :  { %v458_v2 = vpop.f32.mrb[4].mxu0 }
 0x352   :  { %v459_v10 = vadd.f32 %v500_v9, %v458_v2  ;;  %v594_v11 = vpop.f32.mrb[5].mxu0 }
 0x353   :  { %v461_v12 = vpop.f32.mrb[6].mxu0 }
 0x354   :  { %464 = vst [vmem:[#allocation8] sm:$0xff] %v459_v10  ;;  %v595_v13 = vpop.f32.mrb[7].mxu0 }
 0x355   :  { %714 = shalt.err (!%p711_p0)
}
 0x356   :  { %s715_s8 = scalar_lea.hbm %s914_s9, 128 }
 0x357   :  { %p716_p1 = scmp.ne.s32.totalorder %s914_s9, %s715_s8  ;;  %p719_p2 = scmp.lt.u32.totalorder %s715_s8, %s914_s9 }
 0x359   :  { %p721_p3 = pnand %p719_p2, %p716_p1 }
 0x35b   :  { %724 = shalt.err (!%p721_p3)
}
 0x35c   :  { %474 = dma.vmem_to_hbm [thread:$0]  %s472_s13, 128, %s914_s9, [#allocation4]  }
 0x35d   :  { %729 = dma.done.wait [#allocation4], 128  }
 0x35e   :  { %730 = vsyncadd [#allocation4], 4294967168 }
 0x35f   :  { %478 = vsyncpa [#allocation3], 1 }
 0x360   :  { %479 = vsyncpa [#allocation6], 1 }
 0x361   :  { %480 = vsyncpa [#allocation4], 1 }

</bundles_post_ra>
